<compile_context>
chip_gen: v5e
topology: v5e:2x2
jax: 0.10.0
libtpu: 0.0.40
codegen_flags: <defaults>
</compile_context>

<pallas_src>
import functools

import jax
import jax.numpy as jnp
from jax import lax
from jax.experimental import pallas as pl
from jax.experimental.pallas import tpu as pltpu


def _ceil(n, m):
    return ((n + m - 1) // m) * m


def _lstm_head_kernel(x_ref, gate_ref, head_ref, out_ref, *,
                      seq_len, batch, in_dim, hid_dim, cls_pad,
                      off_whh, off_bg, off_bout, off_wcls, off_bcls):
    """Single-program kernel: full LSTM recurrence + Linear/ReLU/Linear head.

    x_ref:    (S*B, I)  bf16, time-major, batch padded to a sublane multiple
    gate_ref: packed bf16 slab  [W_ih^T | W_hh^T | (b_ih+b_hh)], width 4H
    head_ref: packed bf16 slab  [W_out^T | b_out | W_cls^T | b_cls], width Cpad
    out_ref:  (B, Cpad) f32, lane-dense
    """
    S, B, I, H = seq_len, batch, in_dim, hid_dim
    G = 4 * H

    w_ih = gate_ref[0:I, :]                                      # (I, 4H) bf16
    w_hh = gate_ref[off_whh:off_whh + H, :]                      # (H, 4H) bf16
    b_g = gate_ref[off_bg:off_bg + 1, :].astype(jnp.float32)     # (1, 4H)

    # ---- Hoisted input projection for every timestep: one MXU call. ----
    gates_x = (jnp.dot(x_ref[...], w_ih, preferred_element_type=jnp.float32)
               + b_g)                                            # (S*B, 4H) f32

    # Lane mask selecting the "g" (cell candidate) gate block, hoisted.
    lane = lax.broadcasted_iota(jnp.int32, (B, G), 1)
    g_mask = (lane >= 2 * H) & (lane < 3 * H)

    h = jnp.zeros((B, H), jnp.float32)
    c = jnp.zeros((B, H), jnp.float32)

    # ---- Statically unrolled recurrence (S is small & static). ----
    for t in range(S):
        gx_t = gates_x[t * B:(t + 1) * B, :]          # static, sublane-aligned
        gates = gx_t + jnp.dot(h.astype(jnp.bfloat16), w_hh,
                               preferred_element_type=jnp.float32)   # (B, 4H)

        # One EUP pass: sigmoid(x) = 0.5*tanh(0.5*x) + 0.5 folded into the
        # same tanh used by the g block (VPU pre-scale + post-fixup only).
        pre = jnp.where(g_mask, gates, gates * 0.5)
        th = jnp.tanh(pre)
        act = jnp.where(g_mask, th, th * 0.5 + 0.5)

        i_g = act[:, 0 * H:1 * H]
        f_g = act[:, 1 * H:2 * H]
        g_g = act[:, 2 * H:3 * H]
        o_g = act[:, 3 * H:4 * H]

        c = f_g * c + i_g * g_g
        h = o_g * jnp.tanh(c)

    # ---- Head: Linear -> ReLU -> Linear, lane-padded to Cpad columns so the
    # final store is an unmasked full-lane vst. ----
    w_out = head_ref[0:H, :]                                     # (H, Cpad)
    b_out = head_ref[off_bout:off_bout + 1, :].astype(jnp.float32)
    w_cls = head_ref[off_wcls:off_wcls + cls_pad, :]             # (Cpad, Cpad)
    b_cls = head_ref[off_bcls:off_bcls + 1, :].astype(jnp.float32)

    hid = jnp.maximum(
        jnp.dot(h.astype(jnp.bfloat16), w_out,
                preferred_element_type=jnp.float32) + b_out, 0.0)
    logits = (jnp.dot(hid.astype(jnp.bfloat16), w_cls,
                      preferred_element_type=jnp.float32) + b_cls)
    out_ref[...] = logits.astype(out_ref.dtype)


def lstm_model_forward(x, params):
    """x: (batch, seq, input_size) float32 -> (batch, 40) float32."""
    B, S, I = x.shape
    H = params["w_hh"].shape[0] // 4        # lstm_size
    O = params["w_out"].shape[0]            # output_size
    C = params["w_cls"].shape[0]            # 40 classes

    B_pad = max(8, _ceil(B, 8))             # f32 sublane alignment
    W = max(128, _ceil(max(C, O), 128))     # lane-dense head width
    I16 = _ceil(I, 16)                      # bf16 sublane tile = 16 rows
    H16 = _ceil(H, 16)

    # Time-major, batch-padded, flattened (free layout plumbing in XLA).
    x_t = jnp.transpose(x, (1, 0, 2))                           # (S, B, I)
    if B_pad != B:
        x_t = jnp.pad(x_t, ((0, 0), (0, B_pad - B), (0, 0)))
    x_flat = x_t.reshape(S * B_pad, I).astype(jnp.bfloat16)

    # ---- packed gate slab (bf16, width 4H): W_ih^T | W_hh^T | bias ----
    G = 4 * H
    off_whh, off_bg = I16, I16 + H16
    gate_slab = jnp.zeros((off_bg + 16, G), jnp.bfloat16)
    gate_slab = gate_slab.at[0:I, :].set(params["w_ih"].T.astype(jnp.bfloat16))
    gate_slab = gate_slab.at[off_whh:off_whh + H, :].set(
        params["w_hh"].T.astype(jnp.bfloat16))
    gate_slab = gate_slab.at[off_bg, :].set(
        (params["b_ih"] + params["b_hh"]).astype(jnp.bfloat16))

    # ---- packed head slab (bf16, width W): W_out^T | b_out | W_cls^T | b_cls
    off_bout = H16
    off_wcls = H16 + 16
    off_bcls = off_wcls + W
    head_slab = jnp.zeros((off_bcls + 16, W), jnp.bfloat16)
    head_slab = head_slab.at[0:H, 0:O].set(params["w_out"].T.astype(jnp.bfloat16))
    head_slab = head_slab.at[off_bout, 0:O].set(params["b_out"].astype(jnp.bfloat16))
    head_slab = head_slab.at[off_wcls:off_wcls + O, 0:C].set(
        params["w_cls"].T.astype(jnp.bfloat16))
    head_slab = head_slab.at[off_bcls, 0:C].set(params["b_cls"].astype(jnp.bfloat16))

    kernel = functools.partial(
        _lstm_head_kernel, seq_len=S, batch=B_pad, in_dim=I, hid_dim=H,
        cls_pad=W, off_whh=off_whh, off_bg=off_bg,
        off_bout=off_bout, off_wcls=off_wcls, off_bcls=off_bcls)

    vmem = lambda: pl.BlockSpec(memory_space=pltpu.MemorySpace.VMEM)
    out_pad = pl.pallas_call(
        kernel,
        out_shape=jax.ShapeDtypeStruct((B_pad, W), jnp.float32),
        in_specs=[vmem(), vmem(), vmem()],
        out_specs=vmem(),
    )(x_flat, gate_slab, head_slab)

    return out_pad[:B, :C]


def init_params(key, input_size, lstm_size, output_size, n_classes=40):
    """Deterministic init mirroring PyTorch default U(-1/sqrt(fan), 1/sqrt(fan))."""
    ks = jax.random.split(key, 8)
    s_l = 1.0 / jnp.sqrt(lstm_size)
    s_o = 1.0 / jnp.sqrt(lstm_size)
    s_c = 1.0 / jnp.sqrt(output_size)
    u = lambda k, shape, s: jax.random.uniform(k, shape, jnp.float32, -s, s)
    return {
        "w_ih": u(ks[0], (4 * lstm_size, input_size), s_l),
        "w_hh": u(ks[1], (4 * lstm_size, lstm_size), s_l),
        "b_ih": u(ks[2], (4 * lstm_size,), s_l),
        "b_hh": u(ks[3], (4 * lstm_size,), s_l),
        "w_out": u(ks[4], (output_size, lstm_size), s_o),
        "b_out": u(ks[5], (output_size,), s_o),
        "w_cls": u(ks[6], (n_classes, output_size), s_c),
        "b_cls": u(ks[7], (n_classes,), s_c),
    }


def reference_forward(x, p):
    """Pure-JAX f32 reference (lax.scan LSTM) for a correctness check."""
    B = x.shape[0]
    H = p["w_hh"].shape[0] // 4

    def step(carry, x_t):
        h, c = carry
        gates = x_t @ p["w_ih"].T + p["b_ih"] + h @ p["w_hh"].T + p["b_hh"]
        i, f, g, o = jnp.split(gates, 4, axis=-1)
        c = jax.nn.sigmoid(f) * c + jax.nn.sigmoid(i) * jnp.tanh(g)
        h = jax.nn.sigmoid(o) * jnp.tanh(c)
        return (h, c), None

    init = (jnp.zeros((B, H), jnp.float32), jnp.zeros((B, H), jnp.float32))
    (h, _), _ = lax.scan(step, init, jnp.transpose(x, (1, 0, 2)))
    hid = jax.nn.relu(h @ p["w_out"].T + p["b_out"])
    return hid @ p["w_cls"].T + p["b_cls"]


if __name__ == "__main__":
    batch, seq, input_size, lstm_size, output_size = 2, 8, 32, 32, 32

    key = jax.random.PRNGKey(0)
    kx, kp = jax.random.split(key)
    x = jax.random.normal(kx, (batch, seq, input_size), jnp.float32)
    params = init_params(kp, input_size, lstm_size, output_size)

    out = jax.jit(lstm_model_forward)(x, params)
    out = jax.block_until_ready(out)

    ref = reference_forward(x, params)
    assert out.shape == (batch, 40)
    # bf16 MXU operands (f32 accumulation) vs the pure-f32 reference.
    assert jnp.allclose(out, ref, atol=3e-2, rtol=3e-2), "mismatch vs reference"

    print("KERNEL_OK")
</pallas_src>

<mosaic_0001>
module attributes {stable_mosaic.version = 11 : i64} {
  func.func @_lstm_head_kernel(%arg0: memref<64x32xbf16, #tpu.memory_space<vmem>>, %arg1: memref<80x128xbf16, #tpu.memory_space<vmem>>, %arg2: memref<192x128xbf16, #tpu.memory_space<vmem>>, %arg3: memref<8x128xf32, #tpu.memory_space<vmem>>) attributes {dimension_semantics = [], scalar_prefetch = 0 : i64, scratch_operands = 0 : i64, tpu.core_type = #tpu.core_type<tc>} {
    %c0 = arith.constant 0 : index
    %c0_0 = arith.constant 0 : index
    %0 = vector.load %arg1[%c0, %c0_0] : memref<80x128xbf16, #tpu.memory_space<vmem>>, vector<32x128xbf16>
    %c32 = arith.constant 32 : index
    %c0_1 = arith.constant 0 : index
    %1 = vector.load %arg1[%c32, %c0_1] : memref<80x128xbf16, #tpu.memory_space<vmem>>, vector<32x128xbf16>
    %c64 = arith.constant 64 : index
    %c0_2 = arith.constant 0 : index
    %2 = vector.load %arg1[%c64, %c0_2] : memref<80x128xbf16, #tpu.memory_space<vmem>>, vector<1x128xbf16>
    %3 = arith.extf %2 : vector<1x128xbf16> to vector<1x128xf32>
    %c0_3 = arith.constant 0 : index
    %c0_4 = arith.constant 0 : index
    %4 = vector.load %arg0[%c0_3, %c0_4] : memref<64x32xbf16, #tpu.memory_space<vmem>>, vector<64x32xbf16>
    %cst = arith.constant dense<0.000000e+00> : vector<64x128xf32>
    %5 = tpu.matmul %4, %0, %cst {dimension_numbers = #tpu.dot_dimension_numbers<[1], [0], [0], [1], [0, 0, 1, 1], [], []>} : vector<64x32xbf16>, vector<32x128xbf16>, vector<64x128xf32> -> vector<64x128xf32>
    %6 = vector.broadcast %3 : vector<1x128xf32> to vector<64x128xf32>
    %7 = arith.addf %5, %6 : vector<64x128xf32>
    %8 = tpu.iota {dimensions = array<i32: 1>} : vector<8x128xi32>
    %c64_i32 = arith.constant 64 : i32
    %9 = vector.broadcast %c64_i32 : i32 to vector<8x128xi32>
    %10 = arith.cmpi sge, %8, %9 : vector<8x128xi32>
    %c96_i32 = arith.constant 96 : i32
    %11 = vector.broadcast %c96_i32 : i32 to vector<8x128xi32>
    %12 = arith.cmpi slt, %8, %11 : vector<8x128xi32>
    %13 = arith.andi %10, %12 : vector<8x128xi1>
    %cst_5 = arith.constant 0.000000e+00 : f32
    %14 = vector.broadcast %cst_5 : f32 to vector<8x32xf32>
    %cst_6 = arith.constant 0.000000e+00 : f32
    %15 = vector.broadcast %cst_6 : f32 to vector<8x32xf32>
    %16 = vector.extract_strided_slice %7 {offsets = [0, 0], sizes = [8, 128], strides = [1, 1]} : vector<64x128xf32> to vector<8x128xf32>
    %17 = arith.truncf %14 : vector<8x32xf32> to vector<8x32xbf16>
    %cst_7 = arith.constant dense<0.000000e+00> : vector<8x128xf32>
    %18 = tpu.matmul %17, %1, %cst_7 {dimension_numbers = #tpu.dot_dimension_numbers<[1], [0], [0], [1], [0, 0, 1, 1], [], []>} : vector<8x32xbf16>, vector<32x128xbf16>, vector<8x128xf32> -> vector<8x128xf32>
    %19 = arith.addf %16, %18 : vector<8x128xf32>
    %cst_8 = arith.constant 5.000000e-01 : f32
    %20 = vector.broadcast %cst_8 : f32 to vector<8x128xf32>
    %21 = arith.mulf %19, %20 : vector<8x128xf32>
    %22 = arith.select %13, %19, %21 : vector<8x128xi1>, vector<8x128xf32>
    %23 = math.tanh %22 : vector<8x128xf32>
    %cst_9 = arith.constant 5.000000e-01 : f32
    %24 = vector.broadcast %cst_9 : f32 to vector<8x128xf32>
    %25 = arith.mulf %23, %24 : vector<8x128xf32>
    %cst_10 = arith.constant 5.000000e-01 : f32
    %26 = vector.broadcast %cst_10 : f32 to vector<8x128xf32>
    %27 = arith.addf %25, %26 : vector<8x128xf32>
    %28 = arith.select %13, %23, %27 : vector<8x128xi1>, vector<8x128xf32>
    %29 = vector.extract_strided_slice %28 {offsets = [0, 0], sizes = [8, 32], strides = [1, 1]} : vector<8x128xf32> to vector<8x32xf32>
    %30 = vector.extract_strided_slice %28 {offsets = [0, 32], sizes = [8, 32], strides = [1, 1]} : vector<8x128xf32> to vector<8x32xf32>
    %31 = vector.extract_strided_slice %28 {offsets = [0, 64], sizes = [8, 32], strides = [1, 1]} : vector<8x128xf32> to vector<8x32xf32>
    %32 = vector.extract_strided_slice %28 {offsets = [0, 96], sizes = [8, 32], strides = [1, 1]} : vector<8x128xf32> to vector<8x32xf32>
    %33 = arith.mulf %30, %15 : vector<8x32xf32>
    %34 = arith.mulf %29, %31 : vector<8x32xf32>
    %35 = arith.addf %33, %34 : vector<8x32xf32>
    %36 = math.tanh %35 : vector<8x32xf32>
    %37 = arith.mulf %32, %36 : vector<8x32xf32>
    %38 = vector.extract_strided_slice %7 {offsets = [8, 0], sizes = [8, 128], strides = [1, 1]} : vector<64x128xf32> to vector<8x128xf32>
    %39 = arith.truncf %37 : vector<8x32xf32> to vector<8x32xbf16>
    %cst_11 = arith.constant dense<0.000000e+00> : vector<8x128xf32>
    %40 = tpu.matmul %39, %1, %cst_11 {dimension_numbers = #tpu.dot_dimension_numbers<[1], [0], [0], [1], [0, 0, 1, 1], [], []>} : vector<8x32xbf16>, vector<32x128xbf16>, vector<8x128xf32> -> vector<8x128xf32>
    %41 = arith.addf %38, %40 : vector<8x128xf32>
    %cst_12 = arith.constant 5.000000e-01 : f32
    %42 = vector.broadcast %cst_12 : f32 to vector<8x128xf32>
    %43 = arith.mulf %41, %42 : vector<8x128xf32>
    %44 = arith.select %13, %41, %43 : vector<8x128xi1>, vector<8x128xf32>
    %45 = math.tanh %44 : vector<8x128xf32>
    %cst_13 = arith.constant 5.000000e-01 : f32
    %46 = vector.broadcast %cst_13 : f32 to vector<8x128xf32>
    %47 = arith.mulf %45, %46 : vector<8x128xf32>
    %cst_14 = arith.constant 5.000000e-01 : f32
    %48 = vector.broadcast %cst_14 : f32 to vector<8x128xf32>
    %49 = arith.addf %47, %48 : vector<8x128xf32>
    %50 = arith.select %13, %45, %49 : vector<8x128xi1>, vector<8x128xf32>
    %51 = vector.extract_strided_slice %50 {offsets = [0, 0], sizes = [8, 32], strides = [1, 1]} : vector<8x128xf32> to vector<8x32xf32>
    %52 = vector.extract_strided_slice %50 {offsets = [0, 32], sizes = [8, 32], strides = [1, 1]} : vector<8x128xf32> to vector<8x32xf32>
    %53 = vector.extract_strided_slice %50 {offsets = [0, 64], sizes = [8, 32], strides = [1, 1]} : vector<8x128xf32> to vector<8x32xf32>
    %54 = vector.extract_strided_slice %50 {offsets = [0, 96], sizes = [8, 32], strides = [1, 1]} : vector<8x128xf32> to vector<8x32xf32>
    %55 = arith.mulf %52, %35 : vector<8x32xf32>
    %56 = arith.mulf %51, %53 : vector<8x32xf32>
    %57 = arith.addf %55, %56 : vector<8x32xf32>
    %58 = math.tanh %57 : vector<8x32xf32>
    %59 = arith.mulf %54, %58 : vector<8x32xf32>
    %60 = vector.extract_strided_slice %7 {offsets = [16, 0], sizes = [8, 128], strides = [1, 1]} : vector<64x128xf32> to vector<8x128xf32>
    %61 = arith.truncf %59 : vector<8x32xf32> to vector<8x32xbf16>
    %cst_15 = arith.constant dense<0.000000e+00> : vector<8x128xf32>
    %62 = tpu.matmul %61, %1, %cst_15 {dimension_numbers = #tpu.dot_dimension_numbers<[1], [0], [0], [1], [0, 0, 1, 1], [], []>} : vector<8x32xbf16>, vector<32x128xbf16>, vector<8x128xf32> -> vector<8x128xf32>
    %63 = arith.addf %60, %62 : vector<8x128xf32>
    %cst_16 = arith.constant 5.000000e-01 : f32
    %64 = vector.broadcast %cst_16 : f32 to vector<8x128xf32>
    %65 = arith.mulf %63, %64 : vector<8x128xf32>
    %66 = arith.select %13, %63, %65 : vector<8x128xi1>, vector<8x128xf32>
    %67 = math.tanh %66 : vector<8x128xf32>
    %cst_17 = arith.constant 5.000000e-01 : f32
    %68 = vector.broadcast %cst_17 : f32 to vector<8x128xf32>
    %69 = arith.mulf %67, %68 : vector<8x128xf32>
    %cst_18 = arith.constant 5.000000e-01 : f32
    %70 = vector.broadcast %cst_18 : f32 to vector<8x128xf32>
    %71 = arith.addf %69, %70 : vector<8x128xf32>
    %72 = arith.select %13, %67, %71 : vector<8x128xi1>, vector<8x128xf32>
    %73 = vector.extract_strided_slice %72 {offsets = [0, 0], sizes = [8, 32], strides = [1, 1]} : vector<8x128xf32> to vector<8x32xf32>
    %74 = vector.extract_strided_slice %72 {offsets = [0, 32], sizes = [8, 32], strides = [1, 1]} : vector<8x128xf32> to vector<8x32xf32>
    %75 = vector.extract_strided_slice %72 {offsets = [0, 64], sizes = [8, 32], strides = [1, 1]} : vector<8x128xf32> to vector<8x32xf32>
    %76 = vector.extract_strided_slice %72 {offsets = [0, 96], sizes = [8, 32], strides = [1, 1]} : vector<8x128xf32> to vector<8x32xf32>
    %77 = arith.mulf %74, %57 : vector<8x32xf32>
    %78 = arith.mulf %73, %75 : vector<8x32xf32>
    %79 = arith.addf %77, %78 : vector<8x32xf32>
    %80 = math.tanh %79 : vector<8x32xf32>
    %81 = arith.mulf %76, %80 : vector<8x32xf32>
    %82 = vector.extract_strided_slice %7 {offsets = [24, 0], sizes = [8, 128], strides = [1, 1]} : vector<64x128xf32> to vector<8x128xf32>
    %83 = arith.truncf %81 : vector<8x32xf32> to vector<8x32xbf16>
    %cst_19 = arith.constant dense<0.000000e+00> : vector<8x128xf32>
    %84 = tpu.matmul %83, %1, %cst_19 {dimension_numbers = #tpu.dot_dimension_numbers<[1], [0], [0], [1], [0, 0, 1, 1], [], []>} : vector<8x32xbf16>, vector<32x128xbf16>, vector<8x128xf32> -> vector<8x128xf32>
    %85 = arith.addf %82, %84 : vector<8x128xf32>
    %cst_20 = arith.constant 5.000000e-01 : f32
    %86 = vector.broadcast %cst_20 : f32 to vector<8x128xf32>
    %87 = arith.mulf %85, %86 : vector<8x128xf32>
    %88 = arith.select %13, %85, %87 : vector<8x128xi1>, vector<8x128xf32>
    %89 = math.tanh %88 : vector<8x128xf32>
    %cst_21 = arith.constant 5.000000e-01 : f32
    %90 = vector.broadcast %cst_21 : f32 to vector<8x128xf32>
    %91 = arith.mulf %89, %90 : vector<8x128xf32>
    %cst_22 = arith.constant 5.000000e-01 : f32
    %92 = vector.broadcast %cst_22 : f32 to vector<8x128xf32>
    %93 = arith.addf %91, %92 : vector<8x128xf32>
    %94 = arith.select %13, %89, %93 : vector<8x128xi1>, vector<8x128xf32>
    %95 = vector.extract_strided_slice %94 {offsets = [0, 0], sizes = [8, 32], strides = [1, 1]} : vector<8x128xf32> to vector<8x32xf32>
    %96 = vector.extract_strided_slice %94 {offsets = [0, 32], sizes = [8, 32], strides = [1, 1]} : vector<8x128xf32> to vector<8x32xf32>
    %97 = vector.extract_strided_slice %94 {offsets = [0, 64], sizes = [8, 32], strides = [1, 1]} : vector<8x128xf32> to vector<8x32xf32>
    %98 = vector.extract_strided_slice %94 {offsets = [0, 96], sizes = [8, 32], strides = [1, 1]} : vector<8x128xf32> to vector<8x32xf32>
    %99 = arith.mulf %96, %79 : vector<8x32xf32>
    %100 = arith.mulf %95, %97 : vector<8x32xf32>
    %101 = arith.addf %99, %100 : vector<8x32xf32>
    %102 = math.tanh %101 : vector<8x32xf32>
    %103 = arith.mulf %98, %102 : vector<8x32xf32>
    %104 = vector.extract_strided_slice %7 {offsets = [32, 0], sizes = [8, 128], strides = [1, 1]} : vector<64x128xf32> to vector<8x128xf32>
    %105 = arith.truncf %103 : vector<8x32xf32> to vector<8x32xbf16>
    %cst_23 = arith.constant dense<0.000000e+00> : vector<8x128xf32>
    %106 = tpu.matmul %105, %1, %cst_23 {dimension_numbers = #tpu.dot_dimension_numbers<[1], [0], [0], [1], [0, 0, 1, 1], [], []>} : vector<8x32xbf16>, vector<32x128xbf16>, vector<8x128xf32> -> vector<8x128xf32>
    %107 = arith.addf %104, %106 : vector<8x128xf32>
    %cst_24 = arith.constant 5.000000e-01 : f32
    %108 = vector.broadcast %cst_24 : f32 to vector<8x128xf32>
    %109 = arith.mulf %107, %108 : vector<8x128xf32>
    %110 = arith.select %13, %107, %109 : vector<8x128xi1>, vector<8x128xf32>
    %111 = math.tanh %110 : vector<8x128xf32>
    %cst_25 = arith.constant 5.000000e-01 : f32
    %112 = vector.broadcast %cst_25 : f32 to vector<8x128xf32>
    %113 = arith.mulf %111, %112 : vector<8x128xf32>
    %cst_26 = arith.constant 5.000000e-01 : f32
    %114 = vector.broadcast %cst_26 : f32 to vector<8x128xf32>
    %115 = arith.addf %113, %114 : vector<8x128xf32>
    %116 = arith.select %13, %111, %115 : vector<8x128xi1>, vector<8x128xf32>
    %117 = vector.extract_strided_slice %116 {offsets = [0, 0], sizes = [8, 32], strides = [1, 1]} : vector<8x128xf32> to vector<8x32xf32>
    %118 = vector.extract_strided_slice %116 {offsets = [0, 32], sizes = [8, 32], strides = [1, 1]} : vector<8x128xf32> to vector<8x32xf32>
    %119 = vector.extract_strided_slice %116 {offsets = [0, 64], sizes = [8, 32], strides = [1, 1]} : vector<8x128xf32> to vector<8x32xf32>
    %120 = vector.extract_strided_slice %116 {offsets = [0, 96], sizes = [8, 32], strides = [1, 1]} : vector<8x128xf32> to vector<8x32xf32>
    %121 = arith.mulf %118, %101 : vector<8x32xf32>
    %122 = arith.mulf %117, %119 : vector<8x32xf32>
    %123 = arith.addf %121, %122 : vector<8x32xf32>
    %124 = math.tanh %123 : vector<8x32xf32>
    %125 = arith.mulf %120, %124 : vector<8x32xf32>
    %126 = vector.extract_strided_slice %7 {offsets = [40, 0], sizes = [8, 128], strides = [1, 1]} : vector<64x128xf32> to vector<8x128xf32>
    %127 = arith.truncf %125 : vector<8x32xf32> to vector<8x32xbf16>
    %cst_27 = arith.constant dense<0.000000e+00> : vector<8x128xf32>
    %128 = tpu.matmul %127, %1, %cst_27 {dimension_numbers = #tpu.dot_dimension_numbers<[1], [0], [0], [1], [0, 0, 1, 1], [], []>} : vector<8x32xbf16>, vector<32x128xbf16>, vector<8x128xf32> -> vector<8x128xf32>
    %129 = arith.addf %126, %128 : vector<8x128xf32>
    %cst_28 = arith.constant 5.000000e-01 : f32
    %130 = vector.broadcast %cst_28 : f32 to vector<8x128xf32>
    %131 = arith.mulf %129, %130 : vector<8x128xf32>
    %132 = arith.select %13, %129, %131 : vector<8x128xi1>, vector<8x128xf32>
    %133 = math.tanh %132 : vector<8x128xf32>
    %cst_29 = arith.constant 5.000000e-01 : f32
    %134 = vector.broadcast %cst_29 : f32 to vector<8x128xf32>
    %135 = arith.mulf %133, %134 : vector<8x128xf32>
    %cst_30 = arith.constant 5.000000e-01 : f32
    %136 = vector.broadcast %cst_30 : f32 to vector<8x128xf32>
    %137 = arith.addf %135, %136 : vector<8x128xf32>
    %138 = arith.select %13, %133, %137 : vector<8x128xi1>, vector<8x128xf32>
    %139 = vector.extract_strided_slice %138 {offsets = [0, 0], sizes = [8, 32], strides = [1, 1]} : vector<8x128xf32> to vector<8x32xf32>
    %140 = vector.extract_strided_slice %138 {offsets = [0, 32], sizes = [8, 32], strides = [1, 1]} : vector<8x128xf32> to vector<8x32xf32>
    %141 = vector.extract_strided_slice %138 {offsets = [0, 64], sizes = [8, 32], strides = [1, 1]} : vector<8x128xf32> to vector<8x32xf32>
    %142 = vector.extract_strided_slice %138 {offsets = [0, 96], sizes = [8, 32], strides = [1, 1]} : vector<8x128xf32> to vector<8x32xf32>
    %143 = arith.mulf %140, %123 : vector<8x32xf32>
    %144 = arith.mulf %139, %141 : vector<8x32xf32>
    %145 = arith.addf %143, %144 : vector<8x32xf32>
    %146 = math.tanh %145 : vector<8x32xf32>
    %147 = arith.mulf %142, %146 : vector<8x32xf32>
    %148 = vector.extract_strided_slice %7 {offsets = [48, 0], sizes = [8, 128], strides = [1, 1]} : vector<64x128xf32> to vector<8x128xf32>
    %149 = arith.truncf %147 : vector<8x32xf32> to vector<8x32xbf16>
    %cst_31 = arith.constant dense<0.000000e+00> : vector<8x128xf32>
    %150 = tpu.matmul %149, %1, %cst_31 {dimension_numbers = #tpu.dot_dimension_numbers<[1], [0], [0], [1], [0, 0, 1, 1], [], []>} : vector<8x32xbf16>, vector<32x128xbf16>, vector<8x128xf32> -> vector<8x128xf32>
    %151 = arith.addf %148, %150 : vector<8x128xf32>
    %cst_32 = arith.constant 5.000000e-01 : f32
    %152 = vector.broadcast %cst_32 : f32 to vector<8x128xf32>
    %153 = arith.mulf %151, %152 : vector<8x128xf32>
    %154 = arith.select %13, %151, %153 : vector<8x128xi1>, vector<8x128xf32>
    %155 = math.tanh %154 : vector<8x128xf32>
    %cst_33 = arith.constant 5.000000e-01 : f32
    %156 = vector.broadcast %cst_33 : f32 to vector<8x128xf32>
    %157 = arith.mulf %155, %156 : vector<8x128xf32>
    %cst_34 = arith.constant 5.000000e-01 : f32
    %158 = vector.broadcast %cst_34 : f32 to vector<8x128xf32>
    %159 = arith.addf %157, %158 : vector<8x128xf32>
    %160 = arith.select %13, %155, %159 : vector<8x128xi1>, vector<8x128xf32>
    %161 = vector.extract_strided_slice %160 {offsets = [0, 0], sizes = [8, 32], strides = [1, 1]} : vector<8x128xf32> to vector<8x32xf32>
    %162 = vector.extract_strided_slice %160 {offsets = [0, 32], sizes = [8, 32], strides = [1, 1]} : vector<8x128xf32> to vector<8x32xf32>
    %163 = vector.extract_strided_slice %160 {offsets = [0, 64], sizes = [8, 32], strides = [1, 1]} : vector<8x128xf32> to vector<8x32xf32>
    %164 = vector.extract_strided_slice %160 {offsets = [0, 96], sizes = [8, 32], strides = [1, 1]} : vector<8x128xf32> to vector<8x32xf32>
    %165 = arith.mulf %162, %145 : vector<8x32xf32>
    %166 = arith.mulf %161, %163 : vector<8x32xf32>
    %167 = arith.addf %165, %166 : vector<8x32xf32>
    %168 = math.tanh %167 : vector<8x32xf32>
    %169 = arith.mulf %164, %168 : vector<8x32xf32>
    %170 = vector.extract_strided_slice %7 {offsets = [56, 0], sizes = [8, 128], strides = [1, 1]} : vector<64x128xf32> to vector<8x128xf32>
    %171 = arith.truncf %169 : vector<8x32xf32> to vector<8x32xbf16>
    %cst_35 = arith.constant dense<0.000000e+00> : vector<8x128xf32>
    %172 = tpu.matmul %171, %1, %cst_35 {dimension_numbers = #tpu.dot_dimension_numbers<[1], [0], [0], [1], [0, 0, 1, 1], [], []>} : vector<8x32xbf16>, vector<32x128xbf16>, vector<8x128xf32> -> vector<8x128xf32>
    %173 = arith.addf %170, %172 : vector<8x128xf32>
    %cst_36 = arith.constant 5.000000e-01 : f32
    %174 = vector.broadcast %cst_36 : f32 to vector<8x128xf32>
    %175 = arith.mulf %173, %174 : vector<8x128xf32>
    %176 = arith.select %13, %173, %175 : vector<8x128xi1>, vector<8x128xf32>
    %177 = math.tanh %176 : vector<8x128xf32>
    %cst_37 = arith.constant 5.000000e-01 : f32
    %178 = vector.broadcast %cst_37 : f32 to vector<8x128xf32>
    %179 = arith.mulf %177, %178 : vector<8x128xf32>
    %cst_38 = arith.constant 5.000000e-01 : f32
    %180 = vector.broadcast %cst_38 : f32 to vector<8x128xf32>
    %181 = arith.addf %179, %180 : vector<8x128xf32>
    %182 = arith.select %13, %177, %181 : vector<8x128xi1>, vector<8x128xf32>
    %183 = vector.extract_strided_slice %182 {offsets = [0, 0], sizes = [8, 32], strides = [1, 1]} : vector<8x128xf32> to vector<8x32xf32>
    %184 = vector.extract_strided_slice %182 {offsets = [0, 32], sizes = [8, 32], strides = [1, 1]} : vector<8x128xf32> to vector<8x32xf32>
    %185 = vector.extract_strided_slice %182 {offsets = [0, 64], sizes = [8, 32], strides = [1, 1]} : vector<8x128xf32> to vector<8x32xf32>
    %186 = vector.extract_strided_slice %182 {offsets = [0, 96], sizes = [8, 32], strides = [1, 1]} : vector<8x128xf32> to vector<8x32xf32>
    %187 = arith.mulf %184, %167 : vector<8x32xf32>
    %188 = arith.mulf %183, %185 : vector<8x32xf32>
    %189 = arith.addf %187, %188 : vector<8x32xf32>
    %190 = math.tanh %189 : vector<8x32xf32>
    %191 = arith.mulf %186, %190 : vector<8x32xf32>
    %c0_39 = arith.constant 0 : index
    %c0_40 = arith.constant 0 : index
    %192 = vector.load %arg2[%c0_39, %c0_40] : memref<192x128xbf16, #tpu.memory_space<vmem>>, vector<32x128xbf16>
    %c32_41 = arith.constant 32 : index
    %c0_42 = arith.constant 0 : index
    %193 = vector.load %arg2[%c32_41, %c0_42] : memref<192x128xbf16, #tpu.memory_space<vmem>>, vector<1x128xbf16>
    %194 = arith.extf %193 : vector<1x128xbf16> to vector<1x128xf32>
    %c48 = arith.constant 48 : index
    %c0_43 = arith.constant 0 : index
    %195 = vector.load %arg2[%c48, %c0_43] : memref<192x128xbf16, #tpu.memory_space<vmem>>, vector<128x128xbf16>
    %c176 = arith.constant 176 : index
    %c0_44 = arith.constant 0 : index
    %196 = vector.load %arg2[%c176, %c0_44] : memref<192x128xbf16, #tpu.memory_space<vmem>>, vector<1x128xbf16>
    %197 = arith.extf %196 : vector<1x128xbf16> to vector<1x128xf32>
    %198 = arith.truncf %191 : vector<8x32xf32> to vector<8x32xbf16>
    %cst_45 = arith.constant dense<0.000000e+00> : vector<8x128xf32>
    %199 = tpu.matmul %198, %192, %cst_45 {dimension_numbers = #tpu.dot_dimension_numbers<[1], [0], [0], [1], [0, 0, 1, 1], [], []>} : vector<8x32xbf16>, vector<32x128xbf16>, vector<8x128xf32> -> vector<8x128xf32>
    %200 = vector.broadcast %194 : vector<1x128xf32> to vector<8x128xf32>
    %201 = arith.addf %199, %200 : vector<8x128xf32>
    %cst_46 = arith.constant 0.000000e+00 : f32
    %202 = vector.broadcast %cst_46 : f32 to vector<8x128xf32>
    %203 = arith.maximumf %201, %202 : vector<8x128xf32>
    %204 = arith.truncf %203 : vector<8x128xf32> to vector<8x128xbf16>
    %cst_47 = arith.constant dense<0.000000e+00> : vector<8x128xf32>
    %205 = tpu.matmul %204, %195, %cst_47 {dimension_numbers = #tpu.dot_dimension_numbers<[1], [0], [0], [1], [0, 0, 1, 1], [], []>} : vector<8x128xbf16>, vector<128x128xbf16>, vector<8x128xf32> -> vector<8x128xf32>
    %206 = vector.broadcast %197 : vector<1x128xf32> to vector<8x128xf32>
    %207 = arith.addf %205, %206 : vector<8x128xf32>
    %c0_48 = arith.constant 0 : index
    %c0_49 = arith.constant 0 : index
    %208 = vector.load %arg3[%c0_48, %c0_49] : memref<8x128xf32, #tpu.memory_space<vmem>>, vector<8x128xf32>
    tpu.vector_store %arg3[%c0_48, %c0_49], %207 {strides = array<i32>} : memref<8x128xf32, #tpu.memory_space<vmem>>, vector<8x128xf32>,
    return
  }
}

</mosaic_0001>

<bundles_post_ra>
// kernel: lstm_model_forward.1
= control target key start
LH: loop header
LB: loop body
LE: loop exit
PB: predicated region body
PF: predicated region fallthrough
CT: control target
= control target key end

     0   :  { %vm66_vm0 = vcmask 261120   ;;  %v738_v6 = vmov 0   ;;  %v108_v10 = vlaneseq  ;;  %s740_s26 = smov 32   ;;  %s933_s1 = inlined_call_operand.vmem [shape: bf16[80,128], index: 1, kind: input, shape index: {}]   ;;  %s934_s0 = inlined_call_operand.vmem [shape: bf16[64,32], index: 0, kind: input, shape index: {}]   ;;  %s935_s2 = inlined_call_operand.vmem [shape: bf16[192,128], index: 2, kind: input, shape index: {}]   ;;  %s936_s3 = inlined_call_operand.vmem [shape: f32[8,128], index: 3, kind: output, shape index: {}]  }
   0x1   :  { %v684_v0 = vld [vmem:[%s933_s1 + $0x8] sm:$0xff]  ;;  %v767_v1 = vld [vmem:[%s933_s1 + $0x18] sm:$0xff]  ;;  %v683_v2 = vld [vmem:[%s933_s1] sm:$0xff] }
   0x2   :  { %701 = vmatpush.bf16.msra.mxu1 %v684_v0  ;;  %85 = vmatpush.bf16.msra.mxu0 %v684_v0  ;;  %v690_v3 = vld [vmem:[%s934_s0 + $0x18] sm:$0xff]  ;;  %v687_v4 = vld [vmem:[%s934_s0] sm:$0xff]  ;;  %v685_v5 = vld [vmem:[%s933_s1 + $0x10] sm:$0xff]  ;;  %v109_v13 = vand.u32 127, %v108_v10 }
   0x3   :  { %178 = vmatpush.bf16.msra.mxu2 %v767_v1  ;;  %222 = vmatpush.bf16.msra.mxu3 %v767_v1  ;;  %v23_v8 = vld [vmem:[%s933_s1 + $0x20] sm:$0x1]  ;;  %s739_s1 = smov 64   ;;  %v688_v53 = vld [vmem:[%s934_s0 + $0x8] sm:$0xff] }
   0x4   :  { %v24_v9 = vunpack.c.l.bf16 %v23_v8  ;;  %vm110_vm1 = vcmp.ge.s32.totalorder %v109_v13, 64  ;;  %vm111_vm2 = vcmp.lt.s32.totalorder %v109_v13, 96  ;;  %v691_v18 = vld [vmem:[%s935_s2] sm:$0xff] }
   0x5   :  { %vm800_vm3 = vmand %vm110_vm1, %vm111_vm2 }
   0x6   :  { %702 = vmatpush.bf16.msra.mxu1 %v683_v2  ;;  %86 = vmatpush.bf16.msra.mxu0 %v683_v2  ;;  %v797_v12 = vperm.slane %v24_v9, 0 }
   0x7   :  { %179 = vmatpush.bf16.msra.mxu2 %v685_v5  ;;  %223 = vmatpush.bf16.msra.mxu3 %v685_v5 }
   0x9   :  { %626 = vmatmul.msk.bf16.vlgmr.msra.gmra.mxu1 %vm66_vm0, %v690_v3  ;;  %623 = vmatmul.msk.bf16.vlgmr.msra.gmra.mxu0 %vm66_vm0, %v687_v4 }
   0xa   :  { %134 = vmatpush.bf16.msrb.mxu1 %v767_v1 }
   0xb   :  { %310 = vmatpush.bf16.msrb.mxu2 %v767_v1  ;;  %354 = vmatpush.bf16.msrb.mxu3 %v767_v1 }
   0xe   :  { %135 = vmatpush.bf16.msrb.mxu1 %v685_v5 }
   0xf   :  { %311 = vmatpush.bf16.msrb.mxu2 %v685_v5  ;;  %355 = vmatpush.bf16.msrb.mxu3 %v685_v5 }
  0x12   :  { %266 = vmatpush.bf16.msra.mxu1 %v767_v1 }
  0x16   :  { %267 = vmatpush.bf16.msra.mxu1 %v685_v5 }
  0x19   :  { %136 = vmatmul.bf16.vlgmr.msrb.gmra.mxu1 %v738_v6  ;;  %624 = vmatmul.msk.bf16.gmra.mxu0 %vm66_vm0, %v688_v53 }
  0x1a   :  { %398 = vmatpush.bf16.msrb.mxu1 %v767_v1 }
  0x1e   :  { %399 = vmatpush.bf16.msrb.mxu1 %v685_v5 }
  0x86   :  { %v790_v7 = vpop.f32.mrf.mxu1  ;;  %v88_v14 = vpop.f32.mrf.mxu0 }
  0x87   :  { %v89_v15 = vadd.f32 %v88_v14, %v797_v12 }
  0x8e   :  { %v795_v11 = vpop.f32.mrf.mxu1  ;;  %v90_v36 = vpop.f32.mrf.mxu0 }
  0x8f   :  { %v91_v37 = vadd.f32 %v90_v36, %v797_v12  ;;  %v689_v36 = vld [vmem:[%s934_s0 + $0x10] sm:$0xff] }
  0x90   :  { %625 = vmatmul.msk.bf16.gmra.mxu0 %vm66_vm0, %v689_v36 }
  0x96   :  { %v137_v16 = vpop.f32.mrf.mxu1  ;;  %v93_v58 = vpop.f32.mrf.mxu0 }
  0x97   :  { %v141_v17 = vadd.f32 %v137_v16, %v89_v15  ;;  %v94_v59 = vadd.f32 %v93_v58, %v797_v12 }
  0x99   :  { %v142_v19 = vmul.f32 0.5, %v141_v17 }
  0x9b   :  { %v143_v20 = vsel %vm800_vm3, %v141_v17, %v142_v19 }
  0x9c   :  { %706 = vtanh.f32 %v143_v20 }
  0x9e   :  { %v139_v21 = vpop.f32.mrf.mxu1  ;;  %v95_v19 = vpop.f32.mrf.mxu0 }
  0x9f   :  { %v96_v20 = vadd.f32 %v95_v19, %v797_v12 }
  0xa2   :  { %v707_v22 = vpop.eup %706 }
  0xa3   :  { %v145_v23 = vmul.f32 0.5, %v707_v22 }
  0xa5   :  { %v146_v24 = vadd.f32 0.5, %v145_v23 }
  0xa7   :  { %v147_v25 = vsel %vm800_vm3, %v707_v22, %v146_v24 }
  0xa8   :  { %150 = vrot.lane.b32.xlu0 %v147_v25, %s739_s1  ;;  %v148_v28 = vmul.f32 0.0, %v147_v25 }
 0x11a   :  { %v151_v26 = vpop.permute.xlu0 %150 }
 0x11b   :  { %v153_v27 = vmul.f32 %v151_v26, %v147_v25 }
 0x11d   :  { %155 = vrot.lane.b32.xlu0 %v153_v27, %s740_s26 }
 0x18f   :  { %v156_v29 = vpop.permute.xlu0 %155 }
 0x190   :  { %v158_v30 = vadd.f32 %v156_v29, %v148_v28 }
 0x192   :  { %708 = vtanh.f32 %v158_v30 }
 0x198   :  { %v709_v31 = vpop.eup %708 }
 0x199   :  { %161 = vrot.lane.b32.xlu1 %v709_v31, %s739_s1 }
 0x20b   :  { %v162_v32 = vpop.permute.xlu1 %161 }
 0x20c   :  { %v164_v33 = vmul.f32 %v162_v32, %v147_v25 }
 0x20e   :  { %v165_v34 = vpack.c.bf16 %v164_v33, %v164_v33 }
 0x210   :  { %167 = vrot.lane.b32.xlu1 %v165_v34, %s740_s26 }
 0x282   :  { %v168_v35 = vpop.permute.xlu1 %167 }
 0x283   :  { %635 = vmatmul.msk.bf16.vlgmr.msra.gmra.mxu2 %vm66_vm0, %v168_v35 }
 0x284   :  { %442 = vmatpush.bf16.msra.mxu2 %v767_v1 }
 0x288   :  { %443 = vmatpush.bf16.msra.mxu2 %v685_v5 }
 0x306   :  { %v181_v38 = vpop.f32.mrf.mxu2 }
 0x307   :  { %v185_v39 = vadd.f32 %v181_v38, %v91_v37 }
 0x309   :  { %v186_v40 = vmul.f32 0.5, %v185_v39 }
 0x30b   :  { %v187_v41 = vsel %vm800_vm3, %v185_v39, %v186_v40 }
 0x30c   :  { %710 = vtanh.f32 %v187_v41  ;;  %v98_v41 = vpop.f32.mrf.mxu0 }
 0x30e   :  { %v183_v42 = vpop.f32.mrf.mxu2 }
 0x30f   :  { %v99_v42 = vadd.f32 %v98_v41, %v797_v12 }
 0x312   :  { %v711_v43 = vpop.eup %710 }
 0x313   :  { %v189_v44 = vmul.f32 0.5, %v711_v43 }
 0x315   :  { %v190_v45 = vadd.f32 0.5, %v189_v44 }
 0x317   :  { %v191_v46 = vsel %vm800_vm3, %v711_v43, %v190_v45 }
 0x318   :  { %194 = vrot.lane.b32.xlu2 %v191_v46, %s739_s1  ;;  %v192_v49 = vmul.f32 %v191_v46, %v158_v30 }
 0x372   :  { %v195_v47 = vpop.permute.xlu2 %194 }
 0x373   :  { %v197_v48 = vmul.f32 %v195_v47, %v191_v46 }
 0x375   :  { %199 = vrot.lane.b32.xlu2 %v197_v48, %s740_s26 }
 0x3cf   :  { %v200_v50 = vpop.permute.xlu2 %199 }
 0x3d0   :  { %v202_v51 = vadd.f32 %v200_v50, %v192_v49 }
 0x3d2   :  { %712 = vtanh.f32 %v202_v51 }
 0x3d8   :  { %v713_v52 = vpop.eup %712 }
 0x3d9   :  { %205 = vrot.lane.b32.xlu0 %v713_v52, %s739_s1 }
 0x44b   :  { %v206_v54 = vpop.permute.xlu0 %205 }
 0x44c   :  { %v208_v55 = vmul.f32 %v206_v54, %v191_v46 }
 0x44e   :  { %v209_v56 = vpack.c.bf16 %v208_v55, %v208_v55 }
 0x450   :  { %211 = vrot.lane.b32.xlu1 %v209_v56, %s740_s26 }
 0x4c2   :  { %v212_v57 = vpop.permute.xlu1 %211 }
 0x4c3   :  { %636 = vmatmul.msk.bf16.vlgmr.msra.gmra.mxu3 %vm66_vm0, %v212_v57 }
 0x546   :  { %v225_v60 = vpop.f32.mrf.mxu3 }
 0x547   :  { %v229_v61 = vadd.f32 %v225_v60, %v94_v59 }
 0x549   :  { %v230_v62 = vmul.f32 0.5, %v229_v61 }
 0x54b   :  { %v231_v63 = vsel %vm800_vm3, %v229_v61, %v230_v62  ;;  %v100_v62 = vpop.f32.mrf.mxu0 }
 0x54c   :  { %714 = vtanh.f32 %v231_v63  ;;  %v101_v63 = vadd.f32 %v100_v62, %v797_v12  ;;  %v698_v62 = vld [vmem:[%s935_s2 + $0x40] sm:$0xff] }
 0x54e   :  { %v227_v0 = vpop.f32.mrf.mxu3 }
 0x552   :  { %v715_v1 = vpop.eup %714 }
 0x553   :  { %v233_v2 = vmul.f32 0.5, %v715_v1 }
 0x555   :  { %v234_v3 = vadd.f32 0.5, %v233_v2 }
 0x557   :  { %v235_v4 = vsel %vm800_vm3, %v715_v1, %v234_v3 }
 0x558   :  { %238 = vrot.lane.b32.xlu2 %v235_v4, %s739_s1  ;;  %v236_v8 = vmul.f32 %v235_v4, %v202_v51 }
 0x5b2   :  { %v239_v5 = vpop.permute.xlu2 %238 }
 0x5b3   :  { %v241_v6 = vmul.f32 %v239_v5, %v235_v4 }
 0x5b5   :  { %243 = vrot.lane.b32.xlu0 %v241_v6, %s740_s26 }
 0x627   :  { %v244_v9 = vpop.permute.xlu0 %243 }
 0x628   :  { %v246_v10 = vadd.f32 %v244_v9, %v236_v8 }
 0x62a   :  { %716 = vtanh.f32 %v246_v10 }
 0x630   :  { %v717_v13 = vpop.eup %716 }
 0x631   :  { %249 = vrot.lane.b32.xlu1 %v717_v13, %s739_s1 }
 0x6a3   :  { %v250_v14 = vpop.permute.xlu1 %249 }
 0x6a4   :  { %v252_v15 = vmul.f32 %v250_v14, %v235_v4 }
 0x6a6   :  { %v253_v16 = vpack.c.bf16 %v252_v15, %v252_v15 }
 0x6a8   :  { %255 = vrot.lane.b32.xlu2 %v253_v16, %s740_s26 }
 0x702   :  { %v256_v17 = vpop.permute.xlu2 %255 }
 0x703   :  { %637 = vmatmul.msk.bf16.vlgmr.msra.gmra.mxu1 %vm66_vm0, %v256_v17 }
 0x780   :  { %v269_v21 = vpop.f32.mrf.mxu1 }
 0x781   :  { %v273_v22 = vadd.f32 %v269_v21, %v96_v20 }
 0x783   :  { %v274_v23 = vmul.f32 0.5, %v273_v22 }
 0x785   :  { %v275_v24 = vsel %vm800_vm3, %v273_v22, %v274_v23  ;;  %v104_v23 = vadd.f32 %v790_v7, %v797_v12 }
 0x786   :  { %718 = vtanh.f32 %v275_v24 }
 0x788   :  { %v271_v25 = vpop.f32.mrf.mxu1 }
 0x78c   :  { %v719_v26 = vpop.eup %718 }
 0x78d   :  { %v277_v27 = vmul.f32 0.5, %v719_v26 }
 0x78f   :  { %v278_v28 = vadd.f32 0.5, %v277_v27 }
 0x791   :  { %v279_v29 = vsel %vm800_vm3, %v719_v26, %v278_v28 }
 0x792   :  { %282 = vrot.lane.b32.xlu0 %v279_v29, %s739_s1  ;;  %v280_v32 = vmul.f32 %v279_v29, %v246_v10 }
 0x804   :  { %v283_v30 = vpop.permute.xlu0 %282 }
 0x805   :  { %v285_v31 = vmul.f32 %v283_v30, %v279_v29 }
 0x807   :  { %287 = vrot.lane.b32.xlu1 %v285_v31, %s740_s26 }
 0x879   :  { %v288_v33 = vpop.permute.xlu1 %287 }
 0x87a   :  { %v290_v34 = vadd.f32 %v288_v33, %v280_v32 }
 0x87c   :  { %720 = vtanh.f32 %v290_v34 }
 0x882   :  { %v721_v35 = vpop.eup %720 }
 0x883   :  { %293 = vrot.lane.b32.xlu2 %v721_v35, %s739_s1 }
 0x8dd   :  { %v294_v37 = vpop.permute.xlu2 %293 }
 0x8de   :  { %v296_v38 = vmul.f32 %v294_v37, %v279_v29 }
 0x8e0   :  { %v297_v39 = vpack.c.bf16 %v296_v38, %v296_v38 }
 0x8e2   :  { %299 = vrot.lane.b32.xlu0 %v297_v39, %s740_s26 }
 0x954   :  { %v300_v40 = vpop.permute.xlu0 %299 }
 0x955   :  { %638 = vmatmul.msk.bf16.vlgmr.msrb.gmra.mxu2 %vm66_vm0, %v300_v40 }
 0x9d8   :  { %v313_v43 = vpop.f32.mrf.mxu2 }
 0x9d9   :  { %v317_v44 = vadd.f32 %v313_v43, %v99_v42  ;;  %v106_v42 = vadd.f32 %v795_v11, %v797_v12 }
 0x9db   :  { %v318_v45 = vmul.f32 0.5, %v317_v44 }
 0x9dd   :  { %v319_v46 = vsel %vm800_vm3, %v317_v44, %v318_v45 }
 0x9de   :  { %722 = vtanh.f32 %v319_v46 }
 0x9e0   :  { %v315_v47 = vpop.f32.mrf.mxu2 }
 0x9e4   :  { %v723_v48 = vpop.eup %722 }
 0x9e5   :  { %v321_v49 = vmul.f32 0.5, %v723_v48 }
 0x9e7   :  { %v322_v50 = vadd.f32 0.5, %v321_v49 }
 0x9e9   :  { %v323_v51 = vsel %vm800_vm3, %v723_v48, %v322_v50 }
 0x9ea   :  { %326 = vrot.lane.b32.xlu1 %v323_v51, %s739_s1  ;;  %v324_v54 = vmul.f32 %v323_v51, %v290_v34 }
 0xa5c   :  { %v327_v52 = vpop.permute.xlu1 %326 }
 0xa5d   :  { %v329_v53 = vmul.f32 %v327_v52, %v323_v51 }
 0xa5f   :  { %331 = vrot.lane.b32.xlu2 %v329_v53, %s740_s26 }
 0xab9   :  { %v332_v55 = vpop.permute.xlu2 %331 }
 0xaba   :  { %v334_v56 = vadd.f32 %v332_v55, %v324_v54 }
 0xabc   :  { %724 = vtanh.f32 %v334_v56 }
 0xac2   :  { %v725_v57 = vpop.eup %724 }
 0xac3   :  { %337 = vrot.lane.b32.xlu0 %v725_v57, %s739_s1 }
 0xb35   :  { %v338_v58 = vpop.permute.xlu0 %337 }
 0xb36   :  { %v340_v59 = vmul.f32 %v338_v58, %v323_v51 }
 0xb38   :  { %v341_v60 = vpack.c.bf16 %v340_v59, %v340_v59 }
 0xb3a   :  { %343 = vrot.lane.b32.xlu1 %v341_v60, %s740_s26  ;;  %v700_v60 = vld [vmem:[%s935_s2 + $0x50] sm:$0xff] }
 0xb3b   :  { %581 = vmatpush.bf16.msrb.mxu0 %v700_v60 }
 0xbac   :  { %v344_v61 = vpop.permute.xlu1 %343 }
 0xbad   :  { %639 = vmatmul.msk.bf16.vlgmr.msrb.gmra.mxu3 %vm66_vm0, %v344_v61  ;;  %v699_v61 = vld [vmem:[%s935_s2 + $0x48] sm:$0xff] }
 0xbae   :  { %582 = vmatpush.bf16.msrb.mxu0 %v699_v61 }
 0xbb2   :  { %583 = vmatpush.bf16.msrb.mxu0 %v698_v62 }
 0xc30   :  { %v357_v0 = vpop.f32.mrf.mxu3 }
 0xc31   :  { %v361_v1 = vadd.f32 %v357_v0, %v101_v63  ;;  %v697_v63 = vld [vmem:[%s935_s2 + $0x38] sm:$0xff]  ;;  %v696_v0 = vld [vmem:[%s935_s2 + $0x30] sm:$0xff] }
 0xc32   :  { %584 = vmatpush.bf16.msrb.mxu0 %v697_v63 }
 0xc33   :  { %v362_v2 = vmul.f32 0.5, %v361_v1 }
 0xc35   :  { %v363_v3 = vsel %vm800_vm3, %v361_v1, %v362_v2  ;;  %v695_v1 = vld [vmem:[%s935_s2 + $0x28] sm:$0xff]  ;;  %v694_v2 = vld [vmem:[%s935_s2 + $0x20] sm:$0xff] }
 0xc36   :  { %726 = vtanh.f32 %v363_v3  ;;  %585 = vmatpush.bf16.msrb.mxu0 %v696_v0 }
 0xc38   :  { %v359_v4 = vpop.f32.mrf.mxu3 }
 0xc39   :  { %v693_v4 = vld [vmem:[%s935_s2 + $0x18] sm:$0xff] }
 0xc3a   :  { %586 = vmatpush.bf16.msrb.mxu0 %v695_v1 }
 0xc3c   :  { %v727_v5 = vpop.eup %726 }
 0xc3d   :  { %v365_v6 = vmul.f32 0.5, %v727_v5 }
 0xc3e   :  { %587 = vmatpush.bf16.msrb.mxu0 %v694_v2 }
 0xc3f   :  { %v366_v8 = vadd.f32 0.5, %v365_v6 }
 0xc41   :  { %v367_v9 = vsel %vm800_vm3, %v727_v5, %v366_v8  ;;  %v477_v5 = vld [vmem:[%s935_s2 + $0x10] sm:$0x1] }
 0xc42   :  { %370 = vrot.lane.b32.xlu2 %v367_v9, %s739_s1  ;;  %v368_v14 = vmul.f32 %v367_v9, %v334_v56  ;;  %v692_v56 = vld [vmem:[%s935_s2 + $0x8] sm:$0xff]  ;;  %588 = vmatpush.bf16.msrb.mxu0 %v693_v4  ;;  %v478_v6 = vunpack.c.l.bf16 %v477_v5 }
 0xc43   :  { %523 = vmatpush.bf16.msra.mxu3 %v692_v56 }
 0xc44   :  { %v498_v8 = vperm.slane %v478_v6, 0 }
 0xc47   :  { %524 = vmatpush.bf16.msra.mxu3 %v691_v18 }
 0xc9c   :  { %v371_v10 = vpop.permute.xlu2 %370 }
 0xc9d   :  { %v373_v13 = vmul.f32 %v371_v10, %v367_v9 }
 0xc9f   :  { %375 = vrot.lane.b32.xlu0 %v373_v13, %s740_s26 }
 0xd11   :  { %v376_v15 = vpop.permute.xlu0 %375 }
 0xd12   :  { %v378_v16 = vadd.f32 %v376_v15, %v368_v14 }
 0xd14   :  { %728 = vtanh.f32 %v378_v16 }
 0xd1a   :  { %v729_v17 = vpop.eup %728 }
 0xd1b   :  { %381 = vrot.lane.b32.xlu1 %v729_v17, %s739_s1 }
 0xd8d   :  { %v382_v19 = vpop.permute.xlu1 %381 }
 0xd8e   :  { %v384_v20 = vmul.f32 %v382_v19, %v367_v9 }
 0xd90   :  { %v385_v21 = vpack.c.bf16 %v384_v20, %v384_v20 }
 0xd92   :  { %387 = vrot.lane.b32.xlu2 %v385_v21, %s740_s26 }
 0xdec   :  { %v388_v22 = vpop.permute.xlu2 %387 }
 0xded   :  { %640 = vmatmul.msk.bf16.vlgmr.msrb.gmra.mxu1 %vm66_vm0, %v388_v22 }
 0xe6a   :  { %v401_v24 = vpop.f32.mrf.mxu1 }
 0xe6b   :  { %v405_v25 = vadd.f32 %v401_v24, %v104_v23 }
 0xe6d   :  { %v406_v26 = vmul.f32 0.5, %v405_v25 }
 0xe6f   :  { %v407_v27 = vsel %vm800_vm3, %v405_v25, %v406_v26 }
 0xe70   :  { %730 = vtanh.f32 %v407_v27 }
 0xe72   :  { %v403_v28 = vpop.f32.mrf.mxu1 }
 0xe76   :  { %v731_v29 = vpop.eup %730 }
 0xe77   :  { %v409_v30 = vmul.f32 0.5, %v731_v29 }
 0xe79   :  { %v410_v31 = vadd.f32 0.5, %v409_v30 }
 0xe7b   :  { %v411_v32 = vsel %vm800_vm3, %v731_v29, %v410_v31 }
 0xe7c   :  { %414 = vrot.lane.b32.xlu0 %v411_v32, %s739_s1  ;;  %v412_v7 = vmul.f32 %v411_v32, %v378_v16  ;;  %v495_v16 = vld [vmem:[%s935_s2 + $0x58] sm:$0x1] }
 0xe7d   :  { %v496_v17 = vunpack.c.l.bf16 %v495_v16 }
 0xe7f   :  { %v532_v19 = vperm.slane %v496_v17, 0 }
 0xeee   :  { %v415_v33 = vpop.permute.xlu0 %414 }
 0xeef   :  { %v417_v34 = vmul.f32 %v415_v33, %v411_v32 }
 0xef1   :  { %419 = vrot.lane.b32.xlu1 %v417_v34, %s740_s26 }
 0xf63   :  { %v420_v35 = vpop.permute.xlu1 %419 }
 0xf64   :  { %v422_v36 = vadd.f32 %v420_v35, %v412_v7 }
 0xf66   :  { %732 = vtanh.f32 %v422_v36 }
 0xf6c   :  { %v733_v37 = vpop.eup %732 }
 0xf6d   :  { %425 = vrot.lane.b32.xlu2 %v733_v37, %s739_s1 }
 0xfc7   :  { %v426_v38 = vpop.permute.xlu2 %425 }
 0xfc8   :  { %v428_v39 = vmul.f32 %v426_v38, %v411_v32 }
 0xfca   :  { %v429_v40 = vpack.c.bf16 %v428_v39, %v428_v39 }
 0xfcc   :  { %431 = vrot.lane.b32.xlu0 %v429_v40, %s740_s26 }
0x103e   :  { %v432_v41 = vpop.permute.xlu0 %431 }
0x103f   :  { %641 = vmatmul.msk.bf16.vlgmr.msra.gmra.mxu2 %vm66_vm0, %v432_v41 }
0x10c2   :  { %v445_v43 = vpop.f32.mrf.mxu2 }
0x10c3   :  { %v449_v44 = vadd.f32 %v445_v43, %v106_v42 }
0x10c5   :  { %v450_v45 = vmul.f32 0.5, %v449_v44 }
0x10c7   :  { %v451_v46 = vsel %vm800_vm3, %v449_v44, %v450_v45 }
0x10c8   :  { %734 = vtanh.f32 %v451_v46 }
0x10ca   :  { %v447_v47 = vpop.f32.mrf.mxu2 }
0x10ce   :  { %v735_v48 = vpop.eup %734 }
0x10cf   :  { %v453_v49 = vmul.f32 0.5, %v735_v48 }
0x10d1   :  { %v454_v50 = vadd.f32 0.5, %v453_v49 }
0x10d3   :  { %v455_v51 = vsel %vm800_vm3, %v735_v48, %v454_v50 }
0x10d4   :  { %458 = vrot.lane.b32.xlu1 %v455_v51, %s739_s1  ;;  %v456_v11 = vmul.f32 %v455_v51, %v422_v36 }
0x1146   :  { %v459_v52 = vpop.permute.xlu1 %458 }
0x1147   :  { %v461_v53 = vmul.f32 %v459_v52, %v455_v51 }
0x1149   :  { %463 = vrot.lane.b32.xlu2 %v461_v53, %s740_s26 }
0x11a3   :  { %v464_v12 = vpop.permute.xlu2 %463 }
0x11a4   :  { %v466_v54 = vadd.f32 %v464_v12, %v456_v11 }
0x11a6   :  { %736 = vtanh.f32 %v466_v54 }
0x11ac   :  { %v737_v55 = vpop.eup %736 }
0x11ad   :  { %469 = vrot.lane.b32.xlu0 %v737_v55, %s739_s1 }
0x121f   :  { %v470_v57 = vpop.permute.xlu0 %469 }
0x1220   :  { %v472_v58 = vmul.f32 %v470_v57, %v455_v51 }
0x1222   :  { %v497_v59 = vpack.c.bf16 %v472_v58, %v472_v58 }
0x1224   :  { %500 = vrot.lane.b32.xlu1 %v497_v59, %s740_s26 }
0x1296   :  { %v501_v3 = vpop.permute.xlu1 %500 }
0x1297   :  { %650 = vmatmul.msk.bf16.vlgmr.msra.gmra.mxu3 %vm66_vm0, %v501_v3 }
0x131a   :  { %v526_v9 = vpop.f32.mrf.mxu3 }
0x131b   :  { %v527_v10 = vadd.f32 %v526_v9, %v498_v8 }
0x131d   :  { %v530_v13 = vmax.f32 %v527_v10, 0.0 }
0x131f   :  { %v531_v14 = vpack.c.bf16 %v530_v13, %v530_v13 }
0x1321   :  { %589 = vmatmul.bf16.vlgmr.msrb.gmra.mxu0 %v531_v14 }
0x1322   :  { %v528_v15 = vpop.f32.mrf.mxu3 }
0x139e   :  { %v590_v20 = vpop.f32.mrf.mxu0 }
0x139f   :  { %v591_v21 = vadd.f32 %v590_v20, %v532_v19 }
0x13a1   :  { %594 = vst [vmem:[%s936_s3] sm:$0xff] %v591_v21 }
0x13a6   :  { %v592_v22 = vpop.f32.mrf.mxu0 }

</bundles_post_ra>
